<compile_context>
chip_gen: v7x
topology: tpu7x:2x2x1
jax: 0.10.0
libtpu: 0.0.40
codegen_flags: <defaults>
</compile_context>

<pallas_src>
import functools

import jax
import jax.numpy as jnp
from jax import lax
from jax.experimental import pallas as pl
from jax.experimental.pallas import tpu as pltpu


LANE = 128           # lane-dense last dim (multiple of 128 -> unmasked vector stores)
MAX_TILE_ROWS = 512  # big tiles amortize per-grid-step overhead; still tiny vs. VMEM


def _dropout_kernel(seed_ref, x_ref, o_ref, *, p):
    tile_rows, lane = x_ref.shape
    x = x_ref[...]                                        # native dtype, no f32 upcast

    # ---- counter-based PRNG: hash(global element index, seed) -> 32 random bits ----
    row = lax.broadcasted_iota(jnp.uint32, (tile_rows, lane), 0)
    col = lax.broadcasted_iota(jnp.uint32, (tile_rows, lane), 1)
    row_off = (pl.program_id(0) * tile_rows).astype(jnp.uint32)
    idx = (row + row_off) * jnp.uint32(lane) + col        # global element counter

    s = seed_ref[0].astype(jnp.uint32)
    h = (idx * jnp.uint32(0x9E3779B1)) ^ (s * jnp.uint32(0x85EBCA77))
    # murmur3 fmix32 finalizer (pure VPU int32 ops; hidden under HBM traffic)
    h = (h ^ (h >> 16)) * jnp.uint32(0x7FEB352D)
    h = (h ^ (h >> 15)) * jnp.uint32(0x846CA68B)
    h = h ^ (h >> 16)

    # Integer threshold compare on the top 31 bits: P(keep) = 1 - p, no int->float converts.
    bits31 = (h >> 1).astype(jnp.int32)                   # uniform over [0, 2^31)
    threshold = jnp.int32(min(int(p * (1 << 31)), (1 << 31) - 1))
    keep = bits31 >= threshold

    scale = jnp.asarray(1.0 / (1.0 - p), x.dtype)         # inverted-dropout scaling
    o_ref[...] = jnp.where(keep, x * scale, jnp.zeros_like(x))


def custom_dropout(x, p, seed=0):
    """Training-mode dropout matching torch.nn.Dropout(p); identity when p == 0."""
    if p == 0.0:
        return x  # CustomDropout uses `lambda x: x` when p == 0
    assert 0.0 < p < 1.0, "dropout probability must be in [0, 1)"

    orig_shape = x.shape
    n = x.size
    dtype = x.dtype
    # Minimum sublane multiple per dtype width: 8 (4B), 16 (2B), 32 (1B).
    sub_min = {4: 8, 2: 16, 1: 32}[dtype.itemsize]

    rows = -(-n // LANE)                       # ceil(n / LANE)
    rows = -(-rows // sub_min) * sub_min       # round up to sublane multiple
    tile_rows = min(MAX_TILE_ROWS, rows)
    padded_rows = -(-rows // tile_rows) * tile_rows

    xf = jnp.ravel(x)
    pad = padded_rows * LANE - n
    if pad:
        xf = jnp.concatenate([xf, jnp.zeros((pad,), dtype)])
    x2d = xf.reshape(padded_rows, LANE)

    seed_arr = jnp.asarray([seed], jnp.int32)

    out2d = pl.pallas_call(
        functools.partial(_dropout_kernel, p=float(p)),
        out_shape=jax.ShapeDtypeStruct((padded_rows, LANE), dtype),
        grid_spec=pltpu.PrefetchScalarGridSpec(
            num_scalar_prefetch=1,             # seed lands in SMEM, read as seed_ref[0]
            grid=(padded_rows // tile_rows,),
            in_specs=[pl.BlockSpec((tile_rows, LANE), lambda i, seed: (i, 0))],
            out_specs=pl.BlockSpec((tile_rows, LANE), lambda i, seed: (i, 0)),
        ),
        compiler_params=pltpu.CompilerParams(
            dimension_semantics=("parallel",),
            vmem_limit_bytes=32 * 1024 * 1024,
        ),
    )(seed_arr, x2d)

    return out2d.reshape(-1)[:n].reshape(orig_shape)


if __name__ == "__main__":
    key = jax.random.PRNGKey(0)
    # batch=2, seq=8, hidden=128 (lane-dense last dim)
    x = jax.random.normal(key, (2, 8, 128), dtype=jnp.float32)

    # p == 0 -> identity (the `lambda x: x` branch of CustomDropout)
    out0 = jax.block_until_ready(custom_dropout(x, 0.0))
    assert out0.shape == x.shape
    assert jnp.array_equal(out0, x), "p=0 must be identity"

    # p = 0.5 -> training-mode dropout: each element is 0 or x / (1 - p)
    p = 0.5
    out = jax.block_until_ready(custom_dropout(x, p, seed=1234))
    assert out.shape == x.shape

    scaled = x / (1.0 - p)
    ok = jnp.all((out == 0) | jnp.isclose(out, scaled, rtol=1e-6, atol=1e-6))
    assert bool(ok), "kept elements must equal x / (1 - p), dropped must be 0"

    drop_frac = float(jnp.mean((out == 0).astype(jnp.float32)))
    assert 0.3 < drop_frac < 0.7, f"drop fraction {drop_frac} far from p={p}"

    print("KERNEL_OK")
</pallas_src>

<mosaic_0001>
module attributes {stable_mosaic.version = 11 : i64} {
  func.func @_dropout_kernel(%arg0: i32, %arg1: memref<1xi32, #tpu.memory_space<smem>>, %arg2: memref<16x128xf32, #tpu.memory_space<vmem>>, %arg3: memref<16x128xf32, #tpu.memory_space<vmem>>) attributes {dimension_semantics = [#tpu.dimension_semantics<parallel>], iteration_bounds = array<i64: 1>, scalar_prefetch = 1 : i64, scratch_operands = 0 : i64, tpu.core_type = #tpu.core_type<tc>, window_params = [{transform_indices = @transform_0, window_bounds = array<i64: 16, 128>}, {transform_indices = @transform_1, window_bounds = array<i64: 16, 128>}]} {
    %c0 = arith.constant 0 : index
    %c0_0 = arith.constant 0 : index
    %0 = vector.load %arg2[%c0, %c0_0] : memref<16x128xf32, #tpu.memory_space<vmem>>, vector<16x128xf32>
    %1 = tpu.iota {dimensions = array<i32: 0>} : vector<16x128xi32>
    %2 = tpu.iota {dimensions = array<i32: 1>} : vector<16x128xi32>
    %c16_i32 = arith.constant 16 : i32
    %3 = arith.muli %arg0, %c16_i32 : i32
    %4 = vector.broadcast %3 : i32 to vector<16x128xi32>
    %5 = arith.addi %1, %4 : vector<16x128xi32>
    %c128_i32 = arith.constant 128 : i32
    %6 = vector.broadcast %c128_i32 : i32 to vector<16x128xi32>
    %7 = arith.muli %5, %6 : vector<16x128xi32>
    %8 = arith.addi %7, %2 : vector<16x128xi32>
    %c0_1 = arith.constant 0 : index
    %9 = memref.load %arg1[%c0_1] : memref<1xi32, #tpu.memory_space<smem>>
    %c-1640531535_i32 = arith.constant -1640531535 : i32
    %10 = vector.broadcast %c-1640531535_i32 : i32 to vector<16x128xi32>
    %11 = arith.muli %8, %10 : vector<16x128xi32>
    %c-2048144777_i32 = arith.constant -2048144777 : i32
    %12 = arith.muli %9, %c-2048144777_i32 : i32
    %13 = vector.broadcast %12 : i32 to vector<16x128xi32>
    %14 = arith.xori %11, %13 : vector<16x128xi32>
    %c16_i32_2 = arith.constant 16 : i32
    %15 = vector.broadcast %c16_i32_2 : i32 to vector<16x128xi32>
    %16 = arith.shrui %14, %15 : vector<16x128xi32>
    %17 = arith.xori %14, %16 : vector<16x128xi32>
    %c2146121005_i32 = arith.constant 2146121005 : i32
    %18 = vector.broadcast %c2146121005_i32 : i32 to vector<16x128xi32>
    %19 = arith.muli %17, %18 : vector<16x128xi32>
    %c15_i32 = arith.constant 15 : i32
    %20 = vector.broadcast %c15_i32 : i32 to vector<16x128xi32>
    %21 = arith.shrui %19, %20 : vector<16x128xi32>
    %22 = arith.xori %19, %21 : vector<16x128xi32>
    %c-2073254261_i32 = arith.constant -2073254261 : i32
    %23 = vector.broadcast %c-2073254261_i32 : i32 to vector<16x128xi32>
    %24 = arith.muli %22, %23 : vector<16x128xi32>
    %c16_i32_3 = arith.constant 16 : i32
    %25 = vector.broadcast %c16_i32_3 : i32 to vector<16x128xi32>
    %26 = arith.shrui %24, %25 : vector<16x128xi32>
    %27 = arith.xori %24, %26 : vector<16x128xi32>
    %c1_i32 = arith.constant 1 : i32
    %28 = vector.broadcast %c1_i32 : i32 to vector<16x128xi32>
    %29 = arith.shrui %27, %28 : vector<16x128xi32>
    %c1073741824_i32 = arith.constant 1073741824 : i32
    %30 = vector.broadcast %c1073741824_i32 : i32 to vector<16x128xi32>
    %31 = arith.cmpi sge, %29, %30 : vector<16x128xi32>
    %cst = arith.constant 2.000000e+00 : f32
    %32 = vector.broadcast %cst : f32 to vector<16x128xf32>
    %33 = arith.mulf %0, %32 : vector<16x128xf32>
    %cst_4 = arith.constant 0.000000e+00 : f32
    %34 = vector.broadcast %cst_4 : f32 to vector<16x128xf32>
    %35 = arith.select %31, %33, %34 : vector<16x128xi1>, vector<16x128xf32>
    %c0_5 = arith.constant 0 : index
    %c0_6 = arith.constant 0 : index
    %36 = vector.load %arg3[%c0_5, %c0_6] : memref<16x128xf32, #tpu.memory_space<vmem>>, vector<16x128xf32>
    tpu.vector_store %arg3[%c0_5, %c0_6], %35 {strides = array<i32>} : memref<16x128xf32, #tpu.memory_space<vmem>>, vector<16x128xf32>,
    return
  }
  func.func @transform_0(%arg0: i32, %arg1: memref<1xi32, #tpu.memory_space<smem>>) -> (i32, i32) {
    %c0_i32 = arith.constant 0 : i32
    %c0_i32_0 = arith.constant 0 : i32
    return %arg0, %c0_i32 : i32, i32
  }
  func.func @transform_1(%arg0: i32, %arg1: memref<1xi32, #tpu.memory_space<smem>>) -> (i32, i32) {
    %c0_i32 = arith.constant 0 : i32
    %c0_i32_0 = arith.constant 0 : i32
    return %arg0, %c0_i32 : i32, i32
  }
}

</mosaic_0001>

<bundles_post_ra>
// kernel: tpu_custom_call.1
= control target key start
LH: loop header
LB: loop body
LE: loop exit
PB: predicated region body
PF: predicated region fallthrough
CT: control target
= control target key end

     0   :  { %8 = vsyncpa [#allocation5], 0  ;;  %s194_s0 = inlined_call_operand.<no memory space> [shape: s32[1], index: 0, kind: input, shape index: {}]   ;;  %s195_s1 = inlined_call_operand.hbm [shape: f32[16,128], index: 1, kind: input, shape index: {}]   ;;  %s196_s2 = inlined_call_operand.hbm [shape: f32[16,128], index: 2, kind: output, shape index: {}]  }
   0x1   :  { %9 = vsyncpa [#allocation6], 0  ;;  %s142_s9 = smov [#allocation4]   ;;  %s94_s13 = scalar_lea.hbm %s195_s1, 256 }
   0x2   :  { %s15_s10 = sshll.u32 %s142_s9, 4  ;;  %p95_p0 = scmp.ne.s32.totalorder %s195_s1, %s94_s13  ;;  %s16_s10 = int_to_ptr.vmem [resolvable:$true] %s15_s10 }
   0x3   :  { %p98_p1 = scmp.lt.u32.totalorder %s94_s13, %s195_s1 }
   0x5   :  { %p100_p2 = pnand %p98_p1, %p95_p0 }
   0x7   :  { %103 = shalt.err (!%p100_p2)
}
   0x8   :  { %s104_s18 = scalar_lea.vmem %s16_s10, 256  ;;  %p109_p4 = scmp.lt.s32.totalorder %s16_s10, %s16_s10 }
   0x9   :  { %p105_p3 = scmp.ne.s32.totalorder %s16_s10, %s104_s18  ;;  %p110_p5 = scmp.lt.s32.totalorder %s104_s18, %s104_s18 }
   0xb   :  { %p111_p6 = por %p110_p5, %p109_p4 }
   0xd   :  { %p112_p7 = pnand %p111_p6, %p105_p3 }
   0xf   :  { %115 = shalt.err (!%p112_p7)
}
  0x10   :  { %s143_s19 = smov 128   ;;  %s144_s20 = smov 8  }
  0x11   :  { %21 = dma.hbm_to_vmem [thread:$0]  %s195_s1, 256, %s16_s10, [#allocation5], %s143_s19, %s143_s19, %s144_s20  }
  0x12   :  { %138 = dma.done.wait [#allocation5], 256  }
  0x13   :  { %139 = vsyncadd [#allocation5], 4294967040  ;;  %v27_v0 = vlaneseq  ;;  %s43_s25 = smul.u32 2246822519, %s194_s0  ;;  %v25_v24 = vld [vmem:[#allocation4] sm:$0xff]  ;;  %v26_v28 = vld [vmem:[#allocation4 + $0x8] sm:$0xff] }
  0x14   :  { %v67_v30 = vmul.f32 2.0, %v25_v24  ;;  %v68_v33 = vmul.f32 2.0, %v26_v28  ;;  %s145_s0 = smov [#allocation7]  }
  0x15   :  { %v28_v1 = vshrl.u32 %v27_v0, 7  ;;  %v31_v2 = vand.u32 127, %v27_v0  ;;  %v44_v7 = vstv %s43_s25  ;;  %s78_s1 = sshll.u32 %s145_s0, 4  ;;  %s79_s1 = int_to_ptr.vmem [resolvable:$true] %s78_s1 }
  0x16   :  { %s116_s26 = scalar_lea.vmem %s79_s1, 256  ;;  %p121_p9 = scmp.lt.s32.totalorder %s79_s1, %s79_s1 }
  0x17   :  { %v36_v3 = vmul.u32 128, %v28_v1  ;;  %v29_v4 = vadd.s32 8, %v28_v1  ;;  %p117_p8 = scmp.ne.s32.totalorder %s79_s1, %s116_s26  ;;  %p122_p10 = scmp.lt.s32.totalorder %s116_s26, %s116_s26 }
  0x19   :  { %v38_v5 = vadd.s32 %v36_v3, %v31_v2  ;;  %v37_v6 = vmul.u32 128, %v29_v4  ;;  %p123_p11 = por %p122_p10, %p121_p9 }
  0x1b   :  { %v41_v8 = vmul.u32 2654435761, %v38_v5  ;;  %v39_v9 = vadd.s32 %v37_v6, %v31_v2  ;;  %p124_p12 = pnand %p123_p11, %p117_p8 }
  0x1d   :  { %v45_v10 = vxor.u32 %v44_v7, %v41_v8  ;;  %v42_v11 = vmul.u32 2654435761, %v39_v9 }
  0x1f   :  { %v47_v12 = vshrl.u32 %v45_v10, 16  ;;  %v46_v13 = vxor.u32 %v44_v7, %v42_v11 }
  0x21   :  { %v49_v14 = vxor.u32 %v47_v12, %v45_v10  ;;  %v48_v15 = vshrl.u32 %v46_v13, 16 }
  0x23   :  { %v51_v16 = vmul.u32 2146121005, %v49_v14  ;;  %v50_v17 = vxor.u32 %v48_v15, %v46_v13 }
  0x25   :  { %v53_v18 = vshrl.u32 %v51_v16, 15  ;;  %v52_v19 = vmul.u32 2146121005, %v50_v17 }
  0x27   :  { %v55_v20 = vxor.u32 %v53_v18, %v51_v16  ;;  %v54_v21 = vshrl.u32 %v52_v19, 15 }
  0x29   :  { %v57_v22 = vmul.u32 2221713035, %v55_v20  ;;  %v56_v23 = vxor.u32 %v54_v21, %v52_v19 }
  0x2b   :  { %v59_v25 = vshrl.u32 %v57_v22, 16  ;;  %v58_v26 = vmul.u32 2221713035, %v56_v23 }
  0x2d   :  { %v61_v27 = vxor.u32 %v59_v25, %v57_v22  ;;  %v60_v29 = vshrl.u32 %v58_v26, 16 }
  0x2f   :  { %v63_v31 = vshrl.u32 %v61_v27, 1  ;;  %v62_v32 = vxor.u32 %v60_v29, %v58_v26 }
  0x31   :  { %vm65_vm0 = vcmp.ge.s32.totalorder %v63_v31, 1073741824  ;;  %v64_v34 = vshrl.u32 %v62_v32, 1 }
  0x32   :  { %v69_v35 = vsel %vm65_vm0, %v67_v30, 0.0 }
  0x33   :  { %71 = vst [vmem:[#allocation7] sm:$0xff] %v69_v35  ;;  %vm66_vm1 = vcmp.ge.s32.totalorder %v64_v34, 1073741824 }
  0x34   :  { %v70_v36 = vsel %vm66_vm1, %v68_v33, 0.0 }
  0x35   :  { %72 = vst [vmem:[#allocation7 + $0x8] sm:$0xff] %v70_v36 }
  0x36   :  { %127 = shalt.err (!%p124_p12)
}
  0x37   :  { %s128_s29 = scalar_lea.hbm %s196_s2, 256 }
  0x38   :  { %p129_p13 = scmp.ne.s32.totalorder %s196_s2, %s128_s29  ;;  %p132_p0 = scmp.lt.u32.totalorder %s128_s29, %s196_s2 }
  0x3a   :  { %p134_p1 = pnand %p132_p0, %p129_p13 }
  0x3c   :  { %137 = shalt.err (!%p134_p1)
}
  0x3d   :  { %84 = dma.vmem_to_hbm [thread:$0]  %s79_s1, 256, %s196_s2, [#allocation6], %s143_s19, %s143_s19, %s144_s20  }
  0x3e   :  { %140 = dma.done.wait [#allocation6], 256  }
  0x3f   :  { %141 = vsyncadd [#allocation6], 4294967040 }
  0x40   :  { %88 = vsyncpa [#allocation5], 1 }
  0x41   :  { %89 = vsyncpa [#allocation6], 1 }

</bundles_post_ra>
